<compile_context>
chip_gen: v7x
topology: tpu7x:2x2x1
jax: 0.10.0
libtpu: 0.0.40
codegen_flags: <defaults>
</compile_context>

<pallas_src>
import numpy as np
import jax
import jax.numpy as jnp
from jax.experimental import pallas as pl
from jax.experimental.pallas import tpu as pltpu

BN_EPS = 1e-5

# ---------------------------------------------------------------------------
# Small PPM configuration (consistent with the module: reduction = C // nbins)
# ---------------------------------------------------------------------------
IN_DIM = 32
BINS = (1, 2, 3, 6)
NB = len(BINS)
RED_DIM = IN_DIM // NB            # 8
CR_ALL = NB * RED_DIM             # 32  (all pyramid output channels)
N, H, W = 2, 16, 16
HW = H * W                        # 256 -> 2 * 128 lanes (lane-dense)
BBP = 128                         # packed pooled length (sum bin*bin = 50 <= 128)
C_TOTAL = IN_DIM + CR_ALL         # 64
BIN_OFFS = tuple(int(sum(b * b for b in BINS[:i])) for i in range(NB))


# ---------------------------------------------------------------------------
# Pallas kernel: one batch element per grid step, whole PPM fused.
# ---------------------------------------------------------------------------
def ppm_kernel(x_ref, w_ref, bias_ref, mask_ref, pt_ref, ut_ref, o_ref):
    # x_ref   : (C, HW)          o_ref  : (C_TOTAL, HW)
    # w_ref   : (CR_ALL, C)      bias_ref/mask_ref: (CR_ALL, BBP)
    # pt_ref  : (HW, BBP)        ut_ref : (BBP, HW)
    x = x_ref[...]                                                     # (C, HW)

    # identity branch of the concat (full-lane, sublane-aligned store)
    o_ref[0:IN_DIM, :] = x.astype(o_ref.dtype)

    # 1) all bins' BN-folded 1x1 convs at once (conv commutes with avg pool)
    z = jnp.dot(w_ref[...], x, preferred_element_type=jnp.float32)    # (CR_ALL, HW)
    # 2) all bins' adaptive average pools packed into one 128-lane tile
    pooled = jnp.dot(z, pt_ref[...], preferred_element_type=jnp.float32)  # (CR_ALL, BBP)
    # bias + ReLU, then mask out cross-bin garbage columns (cheap VPU ops)
    y = jnp.maximum(pooled + bias_ref[...], 0.0) * mask_ref[...]
    # 3) all bins' bilinear (align_corners) upsamples in one matmul; rows land
    #    directly in concat order.
    up = jnp.dot(y, ut_ref[...], preferred_element_type=jnp.float32)  # (CR_ALL, HW)

    o_ref[IN_DIM:C_TOTAL, :] = up.astype(o_ref.dtype)


def ppm_forward(x_nchw, w_all, bias_all, mask_all, pt_packed, ut_packed):
    n, c, h, w = x_nchw.shape
    hw = h * w
    x2 = x_nchw.reshape(n, c, hw).astype(jnp.float32)

    out = pl.pallas_call(
        ppm_kernel,
        out_shape=jax.ShapeDtypeStruct((n, C_TOTAL, hw), jnp.float32),
        grid=(n,),
        in_specs=[
            pl.BlockSpec((None, c, hw), lambda i: (i, 0, 0)),
            pl.BlockSpec((CR_ALL, IN_DIM), lambda i: (0, 0)),
            pl.BlockSpec((CR_ALL, BBP), lambda i: (0, 0)),
            pl.BlockSpec((CR_ALL, BBP), lambda i: (0, 0)),
            pl.BlockSpec((HW, BBP), lambda i: (0, 0)),
            pl.BlockSpec((BBP, HW), lambda i: (0, 0)),
        ],
        out_specs=pl.BlockSpec((None, C_TOTAL, hw), lambda i: (i, 0, 0)),
        compiler_params=pltpu.CompilerParams(dimension_semantics=("parallel",)),
    )(x2, w_all, bias_all, mask_all, pt_packed, ut_packed)

    return out.reshape(n, C_TOTAL, h, w)


# ---------------------------------------------------------------------------
# Host-side table construction (parameter preprocessing, not Pallas)
# ---------------------------------------------------------------------------
def adaptive_pool_matrix(out_sz, in_sz):
    """1-D AdaptiveAvgPool matrix, PyTorch window semantics."""
    m = np.zeros((out_sz, in_sz), np.float32)
    for i in range(out_sz):
        start = (i * in_sz) // out_sz
        end = -(-((i + 1) * in_sz) // out_sz)        # ceil
        m[i, start:end] = 1.0 / float(end - start)
    return m


def upsample_matrix(out_sz, in_sz):
    """1-D bilinear, align_corners=True interpolation matrix (out_sz, in_sz)."""
    m = np.zeros((out_sz, in_sz), np.float32)
    for h in range(out_sz):
        pos = 0.0 if out_sz == 1 else h * (in_sz - 1) / (out_sz - 1)
        lo = int(np.floor(pos))
        lo = min(max(lo, 0), in_sz - 1)
        hi = min(lo + 1, in_sz - 1)
        frac = min(max(pos - lo, 0.0), 1.0)
        m[h, lo] += 1.0 - frac
        m[h, hi] += frac
    return m


def build_tables(params):
    w_all = np.zeros((CR_ALL, IN_DIM), np.float32)
    bias_all = np.zeros((CR_ALL, BBP), np.float32)
    mask_all = np.zeros((CR_ALL, BBP), np.float32)
    pt_packed = np.zeros((HW, BBP), np.float32)
    ut_packed = np.zeros((BBP, HW), np.float32)

    for b, bsz in enumerate(BINS):
        bb = bsz * bsz
        off = BIN_OFFS[b]
        r0, r1 = b * RED_DIM, (b + 1) * RED_DIM

        Ph = adaptive_pool_matrix(bsz, H)
        Pw = adaptive_pool_matrix(bsz, W)
        P = np.kron(Ph, Pw)                          # (bb, H*W)
        pt_packed[:, off:off + bb] = P.T

        Uh = upsample_matrix(H, bsz)
        Uw = upsample_matrix(W, bsz)
        U = np.kron(Uh, Uw)                          # (H*W, bb)
        ut_packed[off:off + bb, :] = U.T

        p = params[b]
        wmat = np.asarray(p["conv"], np.float32)     # (Cr, C)
        gamma = np.asarray(p["gamma"], np.float32)
        beta = np.asarray(p["beta"], np.float32)
        mean = np.asarray(p["mean"], np.float32)
        var = np.asarray(p["var"], np.float32)
        scale = gamma / np.sqrt(var + BN_EPS)
        w_all[r0:r1, :] = wmat * scale[:, None]      # fold BN scale into weights
        bias = beta - mean * scale
        bias_all[r0:r1, :] = bias[:, None]           # pre-broadcast (lane-dense)
        mask_all[r0:r1, off:off + bb] = 1.0

    return (jnp.asarray(w_all), jnp.asarray(bias_all), jnp.asarray(mask_all),
            jnp.asarray(pt_packed), jnp.asarray(ut_packed))


def build_params(key):
    params = []
    keys = jax.random.split(key, NB * 5)
    for b in range(NB):
        k = keys[b * 5:(b + 1) * 5]
        conv = jax.random.normal(k[0], (RED_DIM, IN_DIM), jnp.float32) / np.sqrt(IN_DIM)
        params.append(dict(
            conv=conv,
            gamma=1.0 + 0.1 * jax.random.normal(k[1], (RED_DIM,), jnp.float32),
            beta=0.1 * jax.random.normal(k[2], (RED_DIM,), jnp.float32),
            mean=0.1 * jax.random.normal(k[3], (RED_DIM,), jnp.float32),
            var=1.0 + 0.25 * jax.random.uniform(k[4], (RED_DIM,), jnp.float32),
        ))
    return params


# ---------------------------------------------------------------------------
# Independent pure-JAX reference (mirrors the PyTorch ops directly)
# ---------------------------------------------------------------------------
def _bilinear_align_corners_nchw(x, out_h, out_w):
    n, c, h, w = x.shape

    def coords(out_sz, in_sz):
        if out_sz == 1 or in_sz == 1:
            pos = jnp.zeros((out_sz,), jnp.float32)
        else:
            pos = jnp.arange(out_sz, dtype=jnp.float32) * (in_sz - 1) / (out_sz - 1)
        lo = jnp.clip(jnp.floor(pos).astype(jnp.int32), 0, in_sz - 1)
        hi = jnp.minimum(lo + 1, in_sz - 1)
        frac = pos - lo.astype(jnp.float32)
        return lo, hi, frac

    h0, h1, hf = coords(out_h, h)
    w0, w1, wf = coords(out_w, w)
    xh = (x[:, :, h0, :] * (1.0 - hf)[None, None, :, None]
          + x[:, :, h1, :] * hf[None, None, :, None])
    return (xh[:, :, :, w0] * (1.0 - wf)[None, None, None, :]
            + xh[:, :, :, w1] * wf[None, None, None, :])


def ppm_reference(x, params):
    n, c, h, w = x.shape
    outs = [x]
    for b, bsz in enumerate(BINS):
        rows = []
        for i in range(bsz):
            hs = (i * h) // bsz
            he = -(-((i + 1) * h) // bsz)
            cols = []
            for j in range(bsz):
                ws = (j * w) // bsz
                we = -(-((j + 1) * w) // bsz)
                cols.append(jnp.mean(x[:, :, hs:he, ws:we], axis=(2, 3)))
            rows.append(jnp.stack(cols, axis=-1))                 # (n, c, bsz)
        pooled = jnp.stack(rows, axis=-2)                         # (n, c, bsz, bsz)

        p = params[b]
        y = jnp.einsum('oc,ncij->noij', p["conv"], pooled)
        scale = p["gamma"] / jnp.sqrt(p["var"] + BN_EPS)
        bias = p["beta"] - p["mean"] * scale
        y = y * scale[None, :, None, None] + bias[None, :, None, None]
        y = jnp.maximum(y, 0.0)
        outs.append(_bilinear_align_corners_nchw(y, h, w))
    return jnp.concatenate(outs, axis=1)


# ---------------------------------------------------------------------------
if __name__ == "__main__":
    key = jax.random.PRNGKey(0)
    kp, kx = jax.random.split(key)
    params = build_params(kp)
    w_all, bias_all, mask_all, pt_packed, ut_packed = build_tables(params)

    x = jax.random.normal(kx, (N, IN_DIM, H, W), jnp.float32)

    fwd = jax.jit(ppm_forward)
    out = fwd(x, w_all, bias_all, mask_all, pt_packed, ut_packed)
    out = jax.block_until_ready(out)

    assert out.shape == (N, C_TOTAL, H, W)
    assert bool(jnp.all(jnp.isfinite(out)))

    ref = jax.block_until_ready(ppm_reference(x, params))
    np.testing.assert_allclose(np.asarray(out), np.asarray(ref),
                               rtol=2e-2, atol=2e-2)

    print("KERNEL_OK")
</pallas_src>

<mosaic_0001>
module attributes {stable_mosaic.version = 11 : i64} {
  func.func @ppm_kernel(%arg0: i32, %arg1: memref<1x32x256xf32, #tpu.memory_space<vmem>>, %arg2: memref<32x32xf32, #tpu.memory_space<vmem>>, %arg3: memref<32x128xf32, #tpu.memory_space<vmem>>, %arg4: memref<32x128xf32, #tpu.memory_space<vmem>>, %arg5: memref<256x128xf32, #tpu.memory_space<vmem>>, %arg6: memref<128x256xf32, #tpu.memory_space<vmem>>, %arg7: memref<1x64x256xf32, #tpu.memory_space<vmem>>) attributes {dimension_semantics = [#tpu.dimension_semantics<parallel>], iteration_bounds = array<i64: 2>, scalar_prefetch = 0 : i64, scratch_operands = 0 : i64, tpu.core_type = #tpu.core_type<tc>, window_params = [{transform_indices = @transform_0, window_bounds = array<i64: 1, 32, 256>}, {pipeline_mode = #tpu.pipeline_mode<synchronous>, transform_indices = @transform_1, window_bounds = array<i64: 32, 32>}, {pipeline_mode = #tpu.pipeline_mode<synchronous>, transform_indices = @transform_2, window_bounds = array<i64: 32, 128>}, {pipeline_mode = #tpu.pipeline_mode<synchronous>, transform_indices = @transform_3, window_bounds = array<i64: 32, 128>}, {pipeline_mode = #tpu.pipeline_mode<synchronous>, transform_indices = @transform_4, window_bounds = array<i64: 256, 128>}, {pipeline_mode = #tpu.pipeline_mode<synchronous>, transform_indices = @transform_5, window_bounds = array<i64: 128, 256>}, {transform_indices = @transform_6, window_bounds = array<i64: 1, 64, 256>}]} {
    %c0 = arith.constant 0 : index
    %c0_0 = arith.constant 0 : index
    %c0_1 = arith.constant 0 : index
    %0 = vector.load %arg1[%c0, %c0_0, %c0_1] : memref<1x32x256xf32, #tpu.memory_space<vmem>>, vector<1x32x256xf32>
    %1 = vector.shape_cast %0 : vector<1x32x256xf32> to vector<32x256xf32>
    %c0_2 = arith.constant 0 : index
    %c0_3 = arith.constant 0 : index
    %c0_4 = arith.constant 0 : index
    %2 = vector.load %arg7[%c0_2, %c0_3, %c0_4] : memref<1x64x256xf32, #tpu.memory_space<vmem>>, vector<1x32x256xf32>
    %3 = vector.shape_cast %2 : vector<1x32x256xf32> to vector<32x256xf32>
    %4 = vector.shape_cast %1 : vector<32x256xf32> to vector<1x32x256xf32>
    tpu.vector_store %arg7[%c0_2, %c0_3, %c0_4], %4 {strides = array<i32>} : memref<1x64x256xf32, #tpu.memory_space<vmem>>, vector<1x32x256xf32>,
    %c0_5 = arith.constant 0 : index
    %c0_6 = arith.constant 0 : index
    %5 = vector.load %arg2[%c0_5, %c0_6] : memref<32x32xf32, #tpu.memory_space<vmem>>, vector<32x32xf32>
    %cst = arith.constant dense<0.000000e+00> : vector<32x256xf32>
    %6 = tpu.matmul %5, %1, %cst {dimension_numbers = #tpu.dot_dimension_numbers<[1], [0], [0], [1], [0, 0, 1, 1], [], []>} : vector<32x32xf32>, vector<32x256xf32>, vector<32x256xf32> -> vector<32x256xf32>
    %c0_7 = arith.constant 0 : index
    %c0_8 = arith.constant 0 : index
    %7 = vector.load %arg5[%c0_7, %c0_8] : memref<256x128xf32, #tpu.memory_space<vmem>>, vector<256x128xf32>
    %cst_9 = arith.constant dense<0.000000e+00> : vector<32x128xf32>
    %8 = tpu.matmul %6, %7, %cst_9 {dimension_numbers = #tpu.dot_dimension_numbers<[1], [0], [0], [1], [0, 0, 1, 1], [], []>} : vector<32x256xf32>, vector<256x128xf32>, vector<32x128xf32> -> vector<32x128xf32>
    %c0_10 = arith.constant 0 : index
    %c0_11 = arith.constant 0 : index
    %9 = vector.load %arg3[%c0_10, %c0_11] : memref<32x128xf32, #tpu.memory_space<vmem>>, vector<32x128xf32>
    %10 = arith.addf %8, %9 : vector<32x128xf32>
    %cst_12 = arith.constant 0.000000e+00 : f32
    %11 = vector.broadcast %cst_12 : f32 to vector<32x128xf32>
    %12 = arith.maximumf %10, %11 : vector<32x128xf32>
    %c0_13 = arith.constant 0 : index
    %c0_14 = arith.constant 0 : index
    %13 = vector.load %arg4[%c0_13, %c0_14] : memref<32x128xf32, #tpu.memory_space<vmem>>, vector<32x128xf32>
    %14 = arith.mulf %12, %13 : vector<32x128xf32>
    %c0_15 = arith.constant 0 : index
    %c0_16 = arith.constant 0 : index
    %15 = vector.load %arg6[%c0_15, %c0_16] : memref<128x256xf32, #tpu.memory_space<vmem>>, vector<128x256xf32>
    %cst_17 = arith.constant dense<0.000000e+00> : vector<32x256xf32>
    %16 = tpu.matmul %14, %15, %cst_17 {dimension_numbers = #tpu.dot_dimension_numbers<[1], [0], [0], [1], [0, 0, 1, 1], [], []>} : vector<32x128xf32>, vector<128x256xf32>, vector<32x256xf32> -> vector<32x256xf32>
    %c0_18 = arith.constant 0 : index
    %c32 = arith.constant 32 : index
    %c0_19 = arith.constant 0 : index
    %17 = vector.load %arg7[%c0_18, %c32, %c0_19] : memref<1x64x256xf32, #tpu.memory_space<vmem>>, vector<1x32x256xf32>
    %18 = vector.shape_cast %17 : vector<1x32x256xf32> to vector<32x256xf32>
    %19 = vector.shape_cast %16 : vector<32x256xf32> to vector<1x32x256xf32>
    tpu.vector_store %arg7[%c0_18, %c32, %c0_19], %19 {strides = array<i32>} : memref<1x64x256xf32, #tpu.memory_space<vmem>>, vector<1x32x256xf32>,
    return
  }
  func.func @transform_0(%arg0: i32) -> (i32, i32, i32) {
    %c0_i32 = arith.constant 0 : i32
    %c0_i32_0 = arith.constant 0 : i32
    %c0_i32_1 = arith.constant 0 : i32
    return %arg0, %c0_i32, %c0_i32_0 : i32, i32, i32
  }
  func.func @transform_1(%arg0: i32) -> (i32, i32) {
    %c0_i32 = arith.constant 0 : i32
    %c0_i32_0 = arith.constant 0 : i32
    %c0_i32_1 = arith.constant 0 : i32
    return %c0_i32, %c0_i32_0 : i32, i32
  }
  func.func @transform_2(%arg0: i32) -> (i32, i32) {
    %c0_i32 = arith.constant 0 : i32
    %c0_i32_0 = arith.constant 0 : i32
    %c0_i32_1 = arith.constant 0 : i32
    return %c0_i32, %c0_i32_0 : i32, i32
  }
  func.func @transform_3(%arg0: i32) -> (i32, i32) {
    %c0_i32 = arith.constant 0 : i32
    %c0_i32_0 = arith.constant 0 : i32
    %c0_i32_1 = arith.constant 0 : i32
    return %c0_i32, %c0_i32_0 : i32, i32
  }
  func.func @transform_4(%arg0: i32) -> (i32, i32) {
    %c0_i32 = arith.constant 0 : i32
    %c0_i32_0 = arith.constant 0 : i32
    %c0_i32_1 = arith.constant 0 : i32
    return %c0_i32, %c0_i32_0 : i32, i32
  }
  func.func @transform_5(%arg0: i32) -> (i32, i32) {
    %c0_i32 = arith.constant 0 : i32
    %c0_i32_0 = arith.constant 0 : i32
    %c0_i32_1 = arith.constant 0 : i32
    return %c0_i32, %c0_i32_0 : i32, i32
  }
  func.func @transform_6(%arg0: i32) -> (i32, i32, i32) {
    %c0_i32 = arith.constant 0 : i32
    %c0_i32_0 = arith.constant 0 : i32
    %c0_i32_1 = arith.constant 0 : i32
    return %arg0, %c0_i32, %c0_i32_0 : i32, i32, i32
  }
}

</mosaic_0001>

<bundles_post_ra>
// kernel: ppm_forward.1
= control target key start
LH: loop header
LB: loop body
LE: loop exit
PB: predicated region body
PF: predicated region fallthrough
CT: control target
= control target key end

     0   :  { %s877_s21 = smov 0   ;;  %s1152_s0 = inlined_call_operand.vmem [shape: f32[2,32,256], index: 0, kind: input, shape index: {}]   ;;  %s1153_s1 = inlined_call_operand.vmem [shape: f32[32,32], index: 1, kind: input, shape index: {}]   ;;  %s1154_s2 = inlined_call_operand.vmem [shape: f32[32,128], index: 2, kind: input, shape index: {}]   ;;  %s1155_s3 = inlined_call_operand.vmem [shape: f32[32,128], index: 3, kind: input, shape index: {}]   ;;  %s1156_s4 = inlined_call_operand.vmem [shape: f32[256,128], index: 4, kind: input, shape index: {}]   ;;  %s1157_s5 = inlined_call_operand.vmem [shape: f32[128,256], index: 5, kind: input, shape index: {}]   ;;  %s1158_s6 = inlined_call_operand.vmem [shape: f32[2,64,256], index: 6, kind: output, shape index: {}]  }
   0x1 LB: > { %s691_s22 = sadd.s32 4294967295, %s839_s21   ;;  %p695_p0 = scmp.ge.s32.totalorder %s839_s21, 1  ;;  %s839_s21 = sphi %s877_s21, %s16_s21  }
   0x2   : > { %p212_p1 = scmp.lt.s32.totalorder %s839_s21, 3 }
   0x4   : > { %p213_p2 = pnand %p695_p0, %p212_p1 }
   0x5   : > { %p242_p3 = scmp.lt.s32.totalorder (!%p213_p2), %s691_s22, 1  ;;  %v841_v0 = vmov (!%p213_p2), 0.0   ;;  %v390_v1 = vld [vmem:[%s1156_s4 + $0x80] sm:$0xff] (!%p213_p2)  ;;  %v391_v2 = vld [vmem:[%s1156_s4 + $0x88] sm:$0xff] (!%p213_p2)  ;;  %v392_v6 = vld [vmem:[%s1156_s4 + $0x90] sm:$0xff] (!%p213_p2)  ;;  %vm272_vm0 = vcmask (!%p213_p2), 261120  }
   0x6   : > { %216 = sbr.rel (%p213_p2) target bundleno = 688 (0x2b0), region = 44  ;;  %349 = vmatprep.mubr.f32.mxu0 (!%p213_p2), %v841_v0  ;;  %v760_v3 = vpack.c.bf16 (!%p213_p2), %v391_v2, %v390_v1  ;;  %v374_v4 = vld [vmem:[%s1156_s4] sm:$0xff] (!%p213_p2)  ;;  %v375_v5 = vld [vmem:[%s1156_s4 + $0x8] sm:$0xff] (!%p213_p2)  ;;  %v393_v8 = vld [vmem:[%s1156_s4 + $0x98] sm:$0xff] (!%p213_p2) }
   0x7   : > { %v762_v7 = vpack.c.bf16 (!%p213_p2), %v375_v5, %v374_v4  ;;  %v376_v9 = vld [vmem:[%s1156_s4 + $0x10] sm:$0xff] (!%p213_p2)  ;;  %v377_v10 = vld [vmem:[%s1156_s4 + $0x18] sm:$0xff] (!%p213_p2)  ;;  %v764_v11 = vpack.c.bf16 (!%p213_p2), %v393_v8, %v392_v6  ;;  %v394_v12 = vld [vmem:[%s1156_s4 + $0xa0] sm:$0xff] (!%p213_p2) }
   0x8   : > { %761 = vmatprep.subr.bf16.mxu1 (!%p213_p2), %v760_v3  ;;  %v395_v13 = vld [vmem:[%s1156_s4 + $0xa8] sm:$0xff] (!%p213_p2)  ;;  %v378_v14 = vld [vmem:[%s1156_s4 + $0x20] sm:$0xff] (!%p213_p2)  ;;  %v766_v15 = vpack.c.bf16 (!%p213_p2), %v377_v10, %v376_v9  ;;  %v396_v17 = vld [vmem:[%s1156_s4 + $0xb0] sm:$0xff] (!%p213_p2) }
   0x9   : > { %763 = vmatpush3.bf16.msra.mxu1 (!%p213_p2), %v762_v7  ;;  %v379_v16 = vld [vmem:[%s1156_s4 + $0x28] sm:$0xff] (!%p213_p2)  ;;  %v397_v18 = vld [vmem:[%s1156_s4 + $0xb8] sm:$0xff] (!%p213_p2)  ;;  %v768_v22 = vpack.c.bf16 (!%p213_p2), %v395_v13, %v394_v12  ;;  %v380_v34 = vld [vmem:[%s1156_s4 + $0x30] sm:$0xff] (!%p213_p2) }
   0xa   : > { %765 = vmatprep.subr.bf16.mxu1 (!%p213_p2), %v764_v11  ;;  %v770_v31 = vpack.c.bf16 (!%p213_p2), %v379_v16, %v378_v14  ;;  %v772_v33 = vpack.c.bf16 (!%p213_p2), %v397_v18, %v396_v17  ;;  %v381_v35 = vld [vmem:[%s1156_s4 + $0x38] sm:$0xff] (!%p213_p2)  ;;  %v398_v36 = vld [vmem:[%s1156_s4 + $0xc0] sm:$0xff] (!%p213_p2)  ;;  %v399_v37 = vld [vmem:[%s1156_s4 + $0xc8] sm:$0xff] (!%p213_p2) }
   0xb   : > { %v774_v38 = vpack.c.bf16 (!%p213_p2), %v381_v35, %v380_v34  ;;  %v268_v39 = vld [vmem:[%s1153_s1] sm:$0xff] (!%p213_p2)  ;;  %v776_v40 = vpack.c.bf16 (!%p213_p2), %v399_v37, %v398_v36  ;;  %v383_v42 = vld [vmem:[%s1156_s4 + $0x48] sm:$0xff] (!%p213_p2)  ;;  %v400_v43 = vld [vmem:[%s1156_s4 + $0xd0] sm:$0xff] (!%p213_p2) }
   0xc   : > { %v382_v41 = vld [vmem:[%s1156_s4 + $0x40] sm:$0xff] (!%p213_p2)  ;;  %v401_v44 = vld [vmem:[%s1156_s4 + $0xd8] sm:$0xff] (!%p213_p2)  ;;  %v269_v46 = vld [vmem:[%s1153_s1 + $0x8] sm:$0xff] (!%p213_p2) }
   0xd   : > { %s1160_s22 = smov (!%p242_p3, %s691_s22), 1  ;;  %767 = vmatpush3.bf16.msra.mxu1 %v766_v15  ;;  %v778_v45 = vpack.c.bf16 %v383_v42, %v382_v41  ;;  %v780_v47 = vpack.c.bf16 %v401_v44, %v400_v43  ;;  %v384_v48 = vld [vmem:[%s1156_s4 + $0x50] sm:$0xff]  ;;  %v385_v49 = vld [vmem:[%s1156_s4 + $0x58] sm:$0xff]  ;;  %v402_v50 = vld [vmem:[%s1156_s4 + $0xe0] sm:$0xff] }
   0xe   : > { %s706_s15 = sshll.u32 %s1160_s22, 6  ;;  %s707_s16 = sshll.u32 %s1160_s22, 7  ;;  %769 = vmatprep.subr.bf16.mxu1 %v768_v22  ;;  %v403_v51 = vld [vmem:[%s1156_s4 + $0xe8] sm:$0xff]  ;;  %v782_v52 = vpack.c.bf16 %v385_v49, %v384_v48  ;;  %v270_v53 = vld [vmem:[%s1153_s1 + $0x10] sm:$0xff]  ;;  %v386_v55 = vld [vmem:[%s1156_s4 + $0x60] sm:$0xff] }
   0xf   : > { %s246_s27 = scalar_lea.vmem %s1152_s0, %s706_s15  ;;  %s934_s11 = scalar_lea.vmem %s1158_s6, %s707_s16  ;;  %v784_v54 = vpack.c.bf16 %v403_v51, %v402_v50  ;;  %v387_v56 = vld [vmem:[%s1156_s4 + $0x68] sm:$0xff]  ;;  %v404_v57 = vld [vmem:[%s1156_s4 + $0xf0] sm:$0xff]  ;;  %v405_v58 = vld [vmem:[%s1156_s4 + $0xf8] sm:$0xff] }
  0x10   : > { %v253_v19 = vld [vmem:[%s246_s27 + $0x8] sm:$0xff]  ;;  %v255_v20 = vld [vmem:[%s246_s27 + $0x18] sm:$0xff]  ;;  %v252_v21 = vld [vmem:[%s246_s27] sm:$0xff]  ;;  %v786_v59 = vpack.c.bf16 %v387_v56, %v386_v55  ;;  %v788_v61 = vpack.c.bf16 %v405_v58, %v404_v57 }
  0x11   : > { %261 = vst [vmem:[%s934_s11 + $0x8] sm:$0xff] %v253_v19  ;;  %263 = vst [vmem:[%s934_s11 + $0x18] sm:$0xff] %v255_v20  ;;  %v752_v23 = vpack.c.bf16 %v255_v20, %v253_v19  ;;  %v254_v24 = vld [vmem:[%s246_s27 + $0x10] sm:$0xff]  ;;  %v257_v25 = vld [vmem:[%s246_s27 + $0x28] sm:$0xff]  ;;  %771 = vmatpush3.bf16.msra.mxu1 %v770_v31 }
  0x12   : > { %260 = vst [vmem:[%s934_s11] sm:$0xff] %v252_v21  ;;  %v259_v26 = vld [vmem:[%s246_s27 + $0x38] sm:$0xff]  ;;  %262 = vst [vmem:[%s934_s11 + $0x10] sm:$0xff] %v254_v24  ;;  %v754_v27 = vpack.c.bf16 %v254_v24, %v252_v21  ;;  %v256_v29 = vld [vmem:[%s246_s27 + $0x20] sm:$0xff]  ;;  %773 = vmatprep.subr.bf16.mxu1 %v772_v33 }
  0x13   : > { %265 = vst [vmem:[%s934_s11 + $0x28] sm:$0xff] %v257_v25  ;;  %267 = vst [vmem:[%s934_s11 + $0x38] sm:$0xff] %v259_v26  ;;  %v756_v28 = vpack.c.bf16 %v259_v26, %v257_v25  ;;  %v258_v30 = vld [vmem:[%s246_s27 + $0x30] sm:$0xff]  ;;  %753 = vmatprep.subr.bf16.mxu0 %v752_v23  ;;  %v271_v60 = vld [vmem:[%s1153_s1 + $0x18] sm:$0xff] }
  0x14   : > { %264 = vst [vmem:[%s934_s11 + $0x20] sm:$0xff] %v256_v29  ;;  %266 = vst [vmem:[%s934_s11 + $0x30] sm:$0xff] %v258_v30  ;;  %755 = vmatpush1.bf16.msra.mxu0 %v754_v27  ;;  %v758_v32 = vpack.c.bf16 %v258_v30, %v256_v29  ;;  %v388_v62 = vld [vmem:[%s1156_s4 + $0x70] sm:$0xff]  ;;  %v389_v63 = vld [vmem:[%s1156_s4 + $0x78] sm:$0xff] }
  0x15   : > { %757 = vmatprep.subr.bf16.mxu0 %v756_v28  ;;  %775 = vmatpush3.bf16.msra.mxu1 %v774_v38  ;;  %v790_v1 = vpack.c.bf16 %v389_v63, %v388_v62  ;;  %v508_v2 = vld [vmem:[%s1157_s5 + $0x8] sm:$0xff]  ;;  %v510_v3 = vld [vmem:[%s1157_s5 + $0x18] sm:$0xff]  ;;  %v507_v4 = vld [vmem:[%s1157_s5] sm:$0xff] }
  0x16   : > { %777 = vmatprep.subr.bf16.mxu1 %v776_v40  ;;  %v792_v5 = vpack.c.bf16 %v510_v3, %v508_v2  ;;  %v509_v6 = vld [vmem:[%s1157_s5 + $0x10] sm:$0xff]  ;;  %v512_v7 = vld [vmem:[%s1157_s5 + $0x28] sm:$0xff]  ;;  %v514_v8 = vld [vmem:[%s1157_s5 + $0x38] sm:$0xff] }
  0x17   : > { %v794_v9 = vpack.c.bf16 %v509_v6, %v507_v4  ;;  %v796_v10 = vpack.c.bf16 %v514_v8, %v512_v7  ;;  %v511_v11 = vld [vmem:[%s1157_s5 + $0x20] sm:$0xff]  ;;  %v513_v12 = vld [vmem:[%s1157_s5 + $0x30] sm:$0xff]  ;;  %v516_v13 = vld [vmem:[%s1157_s5 + $0x48] sm:$0xff] }
  0x18   : > { %759 = vmatpush1.bf16.msra.mxu0 %v758_v32  ;;  %v518_v14 = vld [vmem:[%s1157_s5 + $0x58] sm:$0xff]  ;;  %v798_v15 = vpack.c.bf16 %v513_v12, %v511_v11  ;;  %v515_v17 = vld [vmem:[%s1157_s5 + $0x40] sm:$0xff]  ;;  %v517_v18 = vld [vmem:[%s1157_s5 + $0x50] sm:$0xff] }
  0x19   : > { %779 = vmatpush3.bf16.msra.mxu1 %v778_v45  ;;  %793 = vmatprep.subr.bf16.mxu0 %v792_v5  ;;  %v800_v16 = vpack.c.bf16 %v518_v14, %v516_v13  ;;  %v520_v19 = vld [vmem:[%s1157_s5 + $0x68] sm:$0xff]  ;;  %v522_v20 = vld [vmem:[%s1157_s5 + $0x78] sm:$0xff]  ;;  %v802_v21 = vpack.c.bf16 %v517_v18, %v515_v17  ;;  %v519_v23 = vld [vmem:[%s1157_s5 + $0x60] sm:$0xff] }
  0x1a   : > { %781 = vmatprep.subr.bf16.mxu1 %v780_v47  ;;  %v804_v22 = vpack.c.bf16 %v522_v20, %v520_v19  ;;  %v521_v24 = vld [vmem:[%s1157_s5 + $0x70] sm:$0xff]  ;;  %v524_v25 = vld [vmem:[%s1157_s5 + $0x88] sm:$0xff]  ;;  %v526_v26 = vld [vmem:[%s1157_s5 + $0x98] sm:$0xff] }
  0x1b   : > { %700 = vmatmul.mubr.msk.f32.vlgmr.msra.gmra.mrb[0].mxu0 %vm272_vm0, %v268_v39  ;;  %v806_v27 = vpack.c.bf16 %v521_v24, %v519_v23  ;;  %v808_v28 = vpack.c.bf16 %v526_v26, %v524_v25  ;;  %v523_v29 = vld [vmem:[%s1157_s5 + $0x80] sm:$0xff]  ;;  %v525_v30 = vld [vmem:[%s1157_s5 + $0x90] sm:$0xff]  ;;  %v528_v31 = vld [vmem:[%s1157_s5 + $0xa8] sm:$0xff] }
  0x1c   : > { %355 = vmatprep.mubr.f32.mxu0 %v841_v0  ;;  %795 = vmatpush1.bf16.msra.mxu0 %v794_v9  ;;  %v530_v32 = vld [vmem:[%s1157_s5 + $0xb8] sm:$0xff]  ;;  %v810_v33 = vpack.c.bf16 %v525_v30, %v523_v29  ;;  %v527_v35 = vld [vmem:[%s1157_s5 + $0xa0] sm:$0xff]  ;;  %v529_v36 = vld [vmem:[%s1157_s5 + $0xb0] sm:$0xff] }
  0x1d   : > { %783 = vmatpush3.bf16.msra.mxu1 %v782_v52  ;;  %797 = vmatprep.subr.bf16.mxu0 %v796_v10  ;;  %v812_v34 = vpack.c.bf16 %v530_v32, %v528_v31  ;;  %v814_v37 = vpack.c.bf16 %v529_v36, %v527_v35  ;;  %v534_v47 = vld [vmem:[%s1157_s5 + $0xd8] sm:$0xff]  ;;  %v531_v49 = vld [vmem:[%s1157_s5 + $0xc0] sm:$0xff]  ;;  %v533_v50 = vld [vmem:[%s1157_s5 + $0xd0] sm:$0xff] }
  0x1e   : > { %785 = vmatprep.subr.bf16.mxu1 %v784_v54  ;;  %v818_v51 = vpack.c.bf16 %v533_v50, %v531_v49  ;;  %v536_v52 = vld [vmem:[%s1157_s5 + $0xe8] sm:$0xff]  ;;  %v535_v55 = vld [vmem:[%s1157_s5 + $0xe0] sm:$0xff]  ;;  %v537_v56 = vld [vmem:[%s1157_s5 + $0xf0] sm:$0xff] }
  0x1f   : > { %701 = vmatmul.mubr.msk.f32.gmra.mrb[2].mxu0 %vm272_vm0, %v269_v46  ;;  %v532_v46 = vld [vmem:[%s1157_s5 + $0xc8] sm:$0xff]  ;;  %v822_v57 = vpack.c.bf16 %v537_v56, %v535_v55  ;;  %v408_v9 = vld [vmem:[%s1154_s2 + $0x10] sm:$0xff]  ;;  %v409_v17 = vld [vmem:[%s1154_s2 + $0x18] sm:$0xff] }
  0x20   : > { %361 = vmatprep.mubr.f32.mxu0 %v841_v0  ;;  %799 = vmatpush1.bf16.msra.mxu0 %v798_v15  ;;  %v816_v48 = vpack.c.bf16 %v534_v47, %v532_v46  ;;  %v407_v2 = vld [vmem:[%s1154_s2 + $0x8] sm:$0xff]  ;;  %v501_v19 = vld [vmem:[%s1155_s3 + $0x10] sm:$0xff]  ;;  %v502_v24 = vld [vmem:[%s1155_s3 + $0x18] sm:$0xff] }
  0x21   : > { %787 = vmatpush3.bf16.msra.mxu1 %v786_v59  ;;  %801 = vmatprep.subr.bf16.mxu0 %v800_v16  ;;  %v406_v59 = vld [vmem:[%s1154_s2] sm:$0xff]  ;;  %v500_v11 = vld [vmem:[%s1155_s3 + $0x8] sm:$0xff] }
  0x22   : > { %789 = vmatprep.subr.bf16.mxu1 %v788_v61 }
  0x23   : > { %702 = vmatmul.mubr.msk.f32.gmra.mrb[4].mxu0 %vm272_vm0, %v270_v53  ;;  %v538_v53 = vld [vmem:[%s1157_s5 + $0xf8] sm:$0xff] }
  0x24   : > { %367 = vmatprep.mubr.f32.mxu0 %v841_v0  ;;  %803 = vmatpush1.bf16.msra.mxu0 %v802_v21  ;;  %v820_v54 = vpack.c.bf16 %v538_v53, %v536_v52 }
  0x25   : > { %791 = vmatpush3.bf16.msra.mxu1 %v790_v1  ;;  %805 = vmatprep.subr.bf16.mxu0 %v804_v22  ;;  %v499_v1 = vld [vmem:[%s1155_s3] sm:$0xff] }
  0x27   : > { %703 = vmatmul.mubr.msk.f32.gmra.mrb[6].mxu0 %vm272_vm0, %v271_v60 }
  0x28   : > { %603 = vmatprep.mubr.f32.mxu0 %v841_v0  ;;  %807 = vmatpush1.bf16.msra.mxu0 %v806_v27 }
  0x29   : > { %809 = vmatprep.subr.bf16.mxu0 %v808_v28 }
  0x2c   : > { %811 = vmatpush1.bf16.msra.mxu0 %v810_v33 }
  0x2d   : > { %813 = vmatprep.subr.bf16.mxu0 %v812_v34 }
  0x30   : > { %815 = vmatpush1.bf16.msra.mxu0 %v814_v37 }
  0x31   : > { %817 = vmatprep.subr.bf16.mxu0 %v816_v48 }
  0x34   : > { %819 = vmatpush1.bf16.msra.mxu0 %v818_v51 }
  0x35   : > { %821 = vmatprep.subr.bf16.mxu0 %v820_v54 }
  0x38   : > { %823 = vmatpush1.bf16.msra.mxu0 %v822_v57 }
  0xee   : > { %v351_v38 = vpop.f32.mrb[0].mxu0 }
  0xef   : > { %v353_v39 = vpop.f32.mrb[1].mxu0 }
  0xf0   : > { %474 = vmatprep.mubr.f32.mxu1 %v353_v39 }
  0xf1   : > { %475 = vmatmul.mubr.f32.vlgmr.msra.gmra.mrb[0].mxu1 %v351_v38 }
  0xf2   : > { %v357_v40 = vpop.f32.mrb[2].mxu0 }
  0xf3   : > { %v359_v41 = vpop.f32.mrb[3].mxu0 }
  0xf4   : > { %479 = vmatprep.mubr.f32.mxu1 %v359_v41 }
  0xf5   : > { %480 = vmatmul.mubr.f32.gmra.mrb[2].mxu1 %v357_v40 }
  0xf6   : > { %v363_v42 = vpop.f32.mrb[4].mxu0 }
  0xf7   : > { %v365_v43 = vpop.f32.mrb[5].mxu0 }
  0xf8   : > { %484 = vmatprep.mubr.f32.mxu1 %v365_v43 }
  0xf9   : > { %485 = vmatmul.mubr.f32.gmra.mrb[4].mxu1 %v363_v42 }
  0xfa   : > { %v369_v44 = vpop.f32.mrb[6].mxu0 }
  0xfb   : > { %v371_v45 = vpop.f32.mrb[7].mxu0 }
  0xfc   : > { %489 = vmatprep.mubr.f32.mxu1 %v371_v45 }
  0xfd   : > { %490 = vmatmul.mubr.f32.gmra.mrb[6].mxu1 %v369_v44 }
 0x1c4   : > { %v740_v58 = vpop.f32.mrb[0].mxu1 }
 0x1c5   : > { %v741_v60 = vpop.f32.mrb[1].mxu1 }
 0x1c6   : > { %v742_v61 = vadd.f32 %v741_v60, %v740_v58 }
 0x1c8   : > { %v477_v62 = vadd.f32 %v742_v61, %v406_v59  ;;  %v743_v63 = vpop.f32.mrb[2].mxu1 }
 0x1c9   : > { %v744_v3 = vpop.f32.mrb[3].mxu1 }
 0x1ca   : > { %v495_v4 = vmax.f32 %v477_v62, 0.0  ;;  %v745_v5 = vadd.f32 %v744_v3, %v743_v63 }
 0x1cc   : > { %v503_v6 = vmul.f32 %v499_v1, %v495_v4  ;;  %v482_v7 = vadd.f32 %v745_v5, %v407_v2  ;;  %v746_v8 = vpop.f32.mrb[4].mxu1 }
 0x1cd   : > { %v747_v10 = vpop.f32.mrb[5].mxu1 }
 0x1ce   : > { %v496_v12 = vmax.f32 %v482_v7, 0.0  ;;  %v748_v13 = vadd.f32 %v747_v10, %v746_v8  ;;  %604 = vmatmul.mubr.f32.vlgmr.msra.gmra.mrb[8].mxu0 %v503_v6 }
 0x1cf   : > { %609 = vmatprep.mubr.f32.mxu0 %v841_v0 }
 0x1d0   : > { %v487_v14 = vadd.f32 %v748_v13, %v408_v9  ;;  %v749_v15 = vpop.f32.mrb[6].mxu1  ;;  %v504_v16 = vmul.f32 %v500_v11, %v496_v12 }
 0x1d1   : > { %v750_v18 = vpop.f32.mrb[7].mxu1 }
 0x1d2   : > { %v497_v20 = vmax.f32 %v487_v14, 0.0  ;;  %v751_v21 = vadd.f32 %v750_v18, %v749_v15  ;;  %610 = vmatmul.mubr.f32.gmra.mrb[10].mxu0 %v504_v16 }
 0x1d3   : > { %615 = vmatprep.mubr.f32.mxu0 %v841_v0 }
 0x1d4   : > { %v492_v22 = vadd.f32 %v751_v21, %v409_v17  ;;  %v505_v23 = vmul.f32 %v501_v19, %v497_v20 }
 0x1d6   : > { %v498_v25 = vmax.f32 %v492_v22, 0.0  ;;  %616 = vmatmul.mubr.f32.gmra.mrb[12].mxu0 %v505_v23 }
 0x1d7   : > { %621 = vmatprep.mubr.f32.mxu0 %v841_v0 }
 0x1d8   : > { %v506_v26 = vmul.f32 %v502_v24, %v498_v25 }
 0x1da   : > { %622 = vmatmul.mubr.f32.gmra.mrb[14].mxu0 %v506_v26 }
 0x2a1   : > { %v605_v27 = vpop.f32.mrb[8].mxu0 }
 0x2a2   : > { %628 = vst [vmem:[%s934_s11 + $0x40] sm:$0xff] %v605_v27  ;;  %v607_v28 = vpop.f32.mrb[9].mxu0 }
 0x2a3   : > { %629 = vst [vmem:[%s934_s11 + $0x48] sm:$0xff] %v607_v28 }
 0x2a5   : > { %v611_v29 = vpop.f32.mrb[10].mxu0 }
 0x2a6   : > { %630 = vst [vmem:[%s934_s11 + $0x50] sm:$0xff] %v611_v29  ;;  %v613_v30 = vpop.f32.mrb[11].mxu0 }
 0x2a7   : > { %631 = vst [vmem:[%s934_s11 + $0x58] sm:$0xff] %v613_v30 }
 0x2a9   : > { %v617_v31 = vpop.f32.mrb[12].mxu0 }
 0x2aa   : > { %632 = vst [vmem:[%s934_s11 + $0x60] sm:$0xff] %v617_v31  ;;  %v619_v32 = vpop.f32.mrb[13].mxu0 }
 0x2ab   : > { %633 = vst [vmem:[%s934_s11 + $0x68] sm:$0xff] %v619_v32 }
 0x2ad   : > { %v623_v33 = vpop.f32.mrb[14].mxu0 }
 0x2ae   : > { %634 = vst [vmem:[%s934_s11 + $0x70] sm:$0xff] %v623_v33  ;;  %v625_v34 = vpop.f32.mrb[15].mxu0 }
 0x2af   : > { %635 = vst [vmem:[%s934_s11 + $0x78] sm:$0xff] %v625_v34 }
 0x2b0 PF: > { %s16_s21 = sadd.s32 1, %s839_s21  }
 0x2b1   : > { %p13_p4 = scmp.ge.s32.totalorder %s16_s21, 4  }
 0x2b3   :  { %15 = sbr.rel (!%p13_p4) target bundleno = 1 (0x1), region = 74 }

</bundles_post_ra>
